<compile_context>
chip_gen: v5e
topology: v5e:2x2
jax: 0.10.0
libtpu: 0.0.40
codegen_flags: <defaults>
</compile_context>

<pallas_src>
import jax
import jax.numpy as jnp
from jax.experimental import pallas as pl
from jax.experimental.pallas import tpu as pltpu

# Constants from the module's __init__ (Normalize mean/std).
_MEAN = (0.485, 0.456, 0.406)
_STD = (0.229, 0.224, 0.225)


def _transform_kernel(x_ref, scale_ref, bias_ref, o_ref):
    """One (rows, H*W) block.

    x_ref     : uint8   VMEM tile, shape (R, HW)
    scale_ref : float32 VMEM tile, shape (R, 1)   -- 1/(255*std[channel of row])
    bias_ref  : float32 VMEM tile, shape (R, 1)   -- -mean/std for that row
    o_ref     : float32 VMEM tile, shape (R, HW)
    """
    x = x_ref[...].astype(jnp.float32)
    o_ref[...] = x * scale_ref[...] + bias_ref[...]


def _pick_row_block(nc, hw):
    """Pick a row-block size ~4 MB of HBM traffic per grid step.

    Prefers row counts that are multiples of 32 (uint8 sublane pack factor),
    then 8, and that evenly divide nc so there are no partial edge blocks.
    """
    bytes_per_row = hw * (1 + 4)  # 1 byte in (uint8) + 4 bytes out (f32)
    target_bytes = 4 << 20        # ~4 MB/step; fits v7x's smaller VMEM easily
    max_rows = max(1, target_bytes // bytes_per_row)
    if nc <= max_rows:
        return nc                  # full extent: single block along rows
    for align in (32, 8):
        r = (max_rows // align) * align
        while r >= align:
            if nc % r == 0:
                return r
            r -= align
    # Fall back: largest divisor of nc that fits the target.
    for r in range(min(max_rows, nc), 0, -1):
        if nc % r == 0:
            return r
    return 1


def efficientnet_b0_face_transforms(x):
    """Apply ToImage + ToDtype(float32, scale=True) + Normalize.

    Args:
      x: uint8 array of shape [N, C, H, W] (NCHW, PyTorch convention).
    Returns:
      float32 array of shape [N, C, H, W].
    """
    n, c, h, w = x.shape
    assert c == len(_MEAN), "Normalize expects 3-channel (RGB) input"

    nc = n * c
    hw = h * w

    # Flatten spatial dims -> lane-dense layout (lane axis = H*W).
    x2 = x.reshape(nc, hw)

    # Fold the constants: o = x * scale + bias.
    mean = jnp.asarray(_MEAN, dtype=jnp.float32)
    std = jnp.asarray(_STD, dtype=jnp.float32)
    scale_c = 1.0 / (255.0 * std)          # (C,)
    bias_c = -mean / std                   # (C,)
    scale = jnp.tile(scale_c, n).reshape(nc, 1)   # row order: sample-major, channel-minor
    bias = jnp.tile(bias_c, n).reshape(nc, 1)

    r = _pick_row_block(nc, hw)
    grid = (nc // r,)

    out2 = pl.pallas_call(
        _transform_kernel,
        out_shape=jax.ShapeDtypeStruct((nc, hw), jnp.float32),
        grid_spec=pltpu.PrefetchScalarGridSpec(
            num_scalar_prefetch=0,
            grid=grid,
            in_specs=[
                # Lane dim is the full flattened spatial extent (dense stores);
                # row-block count is tuned for ~4 MB of traffic per step.
                pl.BlockSpec((r, hw), lambda i: (i, 0)),
                pl.BlockSpec((r, 1), lambda i: (i, 0)),
                pl.BlockSpec((r, 1), lambda i: (i, 0)),
            ],
            out_specs=pl.BlockSpec((r, hw), lambda i: (i, 0)),
        ),
        compiler_params=pltpu.CompilerParams(
            dimension_semantics=("parallel",),
        ),
        cost_estimate=pl.CostEstimate(
            flops=2 * nc * hw,
            transcendentals=0,
            bytes_accessed=5 * nc * hw,
        ),
    )(x2, scale, bias)

    return out2.reshape(n, c, h, w)


if __name__ == "__main__":
    key = jax.random.PRNGKey(0)
    # Small, module-consistent shapes: batch=2, 3 RGB channels, 16x16 spatial.
    N, C, H, W = 2, 3, 16, 16
    x = jax.random.randint(key, (N, C, H, W), 0, 256, dtype=jnp.int32).astype(
        jnp.uint8
    )

    out = efficientnet_b0_face_transforms(x)
    out = jax.block_until_ready(out)

    # Reference check in plain JAX (matches the PyTorch Compose semantics).
    mean = jnp.asarray(_MEAN, jnp.float32).reshape(1, C, 1, 1)
    std = jnp.asarray(_STD, jnp.float32).reshape(1, C, 1, 1)
    ref = (x.astype(jnp.float32) / 255.0 - mean) / std
    assert out.shape == (N, C, H, W)
    assert out.dtype == jnp.float32
    assert jnp.allclose(out, ref, atol=1e-5, rtol=1e-5)

    print("KERNEL_OK")
</pallas_src>

<mosaic_0001>
module attributes {stable_mosaic.version = 11 : i64} {
  func.func @_transform_kernel(%arg0: i32, %arg1: memref<6x256xi8, #tpu.memory_space<vmem>>, %arg2: memref<6x1xf32, #tpu.memory_space<vmem>>, %arg3: memref<6x1xf32, #tpu.memory_space<vmem>>, %arg4: memref<6x256xf32, #tpu.memory_space<vmem>>) attributes {dimension_semantics = [#tpu.dimension_semantics<parallel>], iteration_bounds = array<i64: 1>, scalar_prefetch = 0 : i64, scratch_operands = 0 : i64, tpu.core_type = #tpu.core_type<tc>, window_params = [{transform_indices = @transform_0, window_bounds = array<i64: 6, 256>}, {transform_indices = @transform_1, window_bounds = array<i64: 6, 1>}, {transform_indices = @transform_2, window_bounds = array<i64: 6, 1>}, {transform_indices = @transform_3, window_bounds = array<i64: 6, 256>}]} {
    %c0 = arith.constant 0 : index
    %c0_0 = arith.constant 0 : index
    %0 = vector.load %arg1[%c0, %c0_0] : memref<6x256xi8, #tpu.memory_space<vmem>>, vector<6x256xi8>
    %1 = arith.uitofp %0 : vector<6x256xi8> to vector<6x256xf32>
    %c0_1 = arith.constant 0 : index
    %c0_2 = arith.constant 0 : index
    %2 = vector.load %arg2[%c0_1, %c0_2] : memref<6x1xf32, #tpu.memory_space<vmem>>, vector<6x1xf32>
    %3 = vector.broadcast %2 : vector<6x1xf32> to vector<6x256xf32>
    %4 = arith.mulf %1, %3 : vector<6x256xf32>
    %c0_3 = arith.constant 0 : index
    %c0_4 = arith.constant 0 : index
    %5 = vector.load %arg3[%c0_3, %c0_4] : memref<6x1xf32, #tpu.memory_space<vmem>>, vector<6x1xf32>
    %6 = vector.broadcast %5 : vector<6x1xf32> to vector<6x256xf32>
    %7 = arith.addf %4, %6 : vector<6x256xf32>
    %c0_5 = arith.constant 0 : index
    %c0_6 = arith.constant 0 : index
    %8 = vector.load %arg4[%c0_5, %c0_6] : memref<6x256xf32, #tpu.memory_space<vmem>>, vector<6x256xf32>
    tpu.vector_store %arg4[%c0_5, %c0_6], %7 {strides = array<i32>} : memref<6x256xf32, #tpu.memory_space<vmem>>, vector<6x256xf32>,
    return
  }
  func.func @transform_0(%arg0: i32) -> (i32, i32) {
    %c0_i32 = arith.constant 0 : i32
    %c0_i32_0 = arith.constant 0 : i32
    return %arg0, %c0_i32 : i32, i32
  }
  func.func @transform_1(%arg0: i32) -> (i32, i32) {
    %c0_i32 = arith.constant 0 : i32
    %c0_i32_0 = arith.constant 0 : i32
    return %arg0, %c0_i32 : i32, i32
  }
  func.func @transform_2(%arg0: i32) -> (i32, i32) {
    %c0_i32 = arith.constant 0 : i32
    %c0_i32_0 = arith.constant 0 : i32
    return %arg0, %c0_i32 : i32, i32
  }
  func.func @transform_3(%arg0: i32) -> (i32, i32) {
    %c0_i32 = arith.constant 0 : i32
    %c0_i32_0 = arith.constant 0 : i32
    return %arg0, %c0_i32 : i32, i32
  }
}

</mosaic_0001>

<bundles_post_ra>
// kernel: tpu_custom_call.1
= control target key start
LH: loop header
LB: loop body
LE: loop exit
PB: predicated region body
PF: predicated region fallthrough
CT: control target
= control target key end

     0   :  { %v85_v1 = vmov 0   ;;  %s119_s0 = inlined_call_operand.vmem [shape: u8[6,256], index: 0, kind: input, shape index: {}]   ;;  %s120_s1 = inlined_call_operand.vmem [shape: f32[6,1], index: 1, kind: input, shape index: {}]   ;;  %s121_s2 = inlined_call_operand.vmem [shape: f32[6,1], index: 2, kind: input, shape index: {}]   ;;  %s122_s3 = inlined_call_operand.hbm [shape: f32[6,256], index: 3, kind: output, shape index: {}]  }
   0x1   :  { %v22_v0 = vld [vmem:[%s120_s1] sm:$0x3f]  ;;  %58 = vset.pattern.permute.xlu0 %v85_v1 }
   0x2   :  { %8 = vsyncpa [#allocation3], 0  ;;  %25 = vperm.xlu0 %58, %v22_v0   ;;  %v30_v2 = vld [vmem:[%s121_s2] sm:$0x3f]  ;;  %s86_s1 = smov [#allocation2]   ;;  %s47_s2 = sshll.u32 %s122_s3, 4  ;;  %s48_s2 = int_to_ptr.hbm [resolvable:$true] %s47_s2 }
   0x3   :  { %v15_v3 = vld [vmem:[%s119_s0] sm:$0xf]  ;;  %s45_s18 = sshll.u32 %s86_s1, 4  ;;  %s46_s18 = int_to_ptr.vmem [resolvable:$true] %s45_s18 }
   0x4   :  { %v16_v4 = vunpack.c.0.s8 %v15_v3  ;;  %v17_v5 = vunpack.c.1.s8 %v15_v3 }
   0x6   :  { %v18_v6 = vand.u32 255, %v16_v4  ;;  %v19_v7 = vand.u32 255, %v17_v5 }
   0x8   :  { %v20_v9 = vcvt.s32.f32 %v18_v6  ;;  %v21_v10 = vcvt.s32.f32 %v19_v7 }
   0xa   :  { %33 = vperm.xlu0 %58, %v30_v2  }
  0x74   :  { %v26_v8 = vpop.permute.xlu0 %25 }
  0x75   :  { %v28_v11 = vmul.f32 %v26_v8, %v20_v9  ;;  %v29_v12 = vmul.f32 %v26_v8, %v21_v10 }
  0x7c   :  { %v34_v13 = vpop.permute.xlu0 %33 }
  0x7d   :  { %v36_v14 = vadd.f32 %v34_v13, %v28_v11  ;;  %v37_v15 = vadd.f32 %v34_v13, %v29_v12 }
  0x7f   :  { %38 = vst [vmem:[#allocation2] sm:$0x3f] %v36_v14 }
  0x80   :  { %39 = vst [vmem:[#allocation2 + $0x8] sm:$0x3f] %v37_v15 }
  0x81   :  { %50 = dma.vmem_to_hbm [thread:$0]  %s46_s18, 256, %s48_s2, [#allocation3]  }
  0x82   :  { %83 = dma.done.wait [#allocation3], 256  }
  0x83   :  { %84 = vsyncadd [#allocation3], 4294967040 }
  0x84   :  { %55 = vsyncpa [#allocation3], 1 }

</bundles_post_ra>
